<compile_context>
chip_gen: v6e
topology: v6e:2x2x1
jax: 0.10.0
libtpu: 0.0.40
codegen_flags: <defaults>
</compile_context>

<pallas_src>
import jax
import jax.numpy as jnp
import numpy as np
from jax.experimental import pallas as pl
from jax.experimental.pallas import tpu as pltpu

N = 16          # number of graph nodes / bboxes
H = 4           # max heads per head list (padded with -1 / all-zero one-hot rows)
N2 = 2 * N      # block-diagonal packing of the two graphs

# Reachability coverage: heads·M^(1+2+4+8) = heads·M^15 covers shortest paths
# of length <= 15 = N-1 inside each N-node block (M includes the identity).
assert 1 + 2 + 4 + 8 >= N - 1, "squaring chain too short for this N"
# Clamp-free counts stay finite/positive: max entry <= N2**15 << f32 max.
assert float(N2) ** 15 < 3.0e38, "unclamped path counts would overflow f32"


def bbox_loss_kernel(packed_ref, bb_ref, out_ref):
    # packed_ref : (48, 32) bf16
    #     rows [0:32)  = M = min(I + blockdiag(sym(gp_), sym(gp_S)), 1)
    #     rows [32:48) = one-hot heads; rows [0:H) question, [H:2H) answer
    #                    (columns 0..N-1), [2H:3H) pred_question, [3H:4H)
    #                    pred_answer (columns N..2N-1); padded rows all zero.
    # bb_ref     : (4, 32) f32 coord-major bboxes [x1; y1; x2; y2], tiled
    #              identically over both column halves.
    # out_ref    : (1, 1) f32 summed loss.

    # Per-node bbox "size": |x2 - x1| + |y2 - y1| -> (1, N2).  Pure VPU work,
    # issued before the matmul chain so it hides under MXU latency.
    s = (jnp.abs(bb_ref[2:3, :] - bb_ref[0:1, :])
         + jnp.abs(bb_ref[3:4, :] - bb_ref[1:2, :]))

    m = packed_ref[0:N2, :]                # (32, 32) bf16, 0/1
    heads = packed_ref[N2:N2 + 4 * H, :]   # (16, 32) bf16, one-hot

    def mm(a, b):
        return jnp.dot(a, b, preferred_element_type=jnp.float32)

    # Heads folded into the repeated-squaring chain.  No intermediate clamps:
    # zero stays exactly zero through f32 accumulation and bf16 downcast,
    # nonzero entries stay >= 1, so the final (R > 0) test is exact.
    r = mm(heads, m).astype(jnp.bfloat16)   # paths <= 1
    p = mm(m, m).astype(jnp.bfloat16)       # paths <= 2   (independent of r)
    r = mm(r, p).astype(jnp.bfloat16)       # paths <= 3
    p = mm(p, p).astype(jnp.bfloat16)       # paths <= 4
    r = mm(r, p).astype(jnp.bfloat16)       # paths <= 7
    p = mm(p, p).astype(jnp.bfloat16)       # paths <= 8
    rf = mm(r, p)                           # paths <= 15, f32

    # Per-head connected-component indicator (includes the head itself).
    r_ind = jnp.where(rf > 0.0, 1.0, 0.0)               # (4H, N2) exact 0/1

    num = jnp.sum(r_ind * s, axis=-1, keepdims=True)    # (4H, 1) sum of sizes
    den = jnp.sum(r_ind, axis=-1, keepdims=True)        # (4H, 1) |component|
    valid = (den > 0.0).astype(jnp.float32)              # padded head rows -> 0
    per_head = jnp.where(den > 0.0, num / jnp.maximum(den, 1.0), 0.0)

    def group_mean(lo):
        gs = jnp.sum(per_head[lo:lo + H], axis=0, keepdims=True)  # (1, 1)
        gc = jnp.sum(valid[lo:lo + H], axis=0, keepdims=True)     # (1, 1)
        # Empty head list -> ZeroDivisionError branch of the reference -> 0.
        return jnp.where(gc > 0.0, gs / jnp.maximum(gc, 1.0), 0.0)

    que_loss = group_mean(0)
    ans_loss = group_mean(H)
    pred_que_loss = group_mean(2 * H)
    pred_ans_loss = group_mean(3 * H)

    out_ref[...] = (jnp.abs(pred_que_loss - que_loss)
                    + jnp.abs(pred_ans_loss - ans_loss))


def _bbox_loss_pallas(packed, bboxes2):
    out = pl.pallas_call(
        bbox_loss_kernel,
        out_shape=jax.ShapeDtypeStruct((1, 1), jnp.float32),
        in_specs=[pl.BlockSpec(memory_space=pltpu.MemorySpace.VMEM)] * 2,
        out_specs=pl.BlockSpec(memory_space=pltpu.MemorySpace.VMEM),
    )(packed, bboxes2)
    return out[0, 0]


# ------------- packing + kernel call fused under a single jit -------------

@jax.jit
def bbox_loss_forward(gp_, gp_S, ex_bboxes, heads_idx):
    # gp_, gp_S : (N, N) float adjacency matrices
    # ex_bboxes : (N, 4) float32 [x1, y1, x2, y2]
    # heads_idx : (4, H) int32 head indices, -1 padding
    #             rows: question, answer (graph gp_), pred_question,
    #                   pred_answer (graph gp_S)
    def sym(g):
        # nx.Graph(adjacency) is undirected: edge (i,j) if g[i,j] or g[j,i].
        return jnp.where((g != 0) | (g.T != 0), 1.0, 0.0).astype(jnp.float32)

    a_big = jnp.zeros((N2, N2), jnp.float32)
    a_big = a_big.at[:N, :N].set(sym(gp_)).at[N:, N:].set(sym(gp_S))
    m0 = jnp.minimum(a_big + jnp.eye(N2, dtype=jnp.float32), 1.0)

    # One-hot heads: groups 0,1 index into the gp_ block, groups 2,3 into gp_S.
    offs = jnp.array([0, 0, N, N], dtype=jnp.int32).reshape(4, 1)
    tgt = jnp.where(heads_idx >= 0, heads_idx + offs, -1)        # (4, H)
    cols = jnp.arange(N2, dtype=jnp.int32).reshape(1, N2)
    oh = (tgt.reshape(4 * H, 1) == cols).astype(jnp.float32)     # (4H, N2)

    packed = jnp.concatenate([m0, oh], axis=0).astype(jnp.bfloat16)  # (48, 32)

    bb_t = ex_bboxes.T.astype(jnp.float32)            # (4, N): x1, y1, x2, y2
    bboxes2 = jnp.concatenate([bb_t, bb_t], axis=1)   # (4, N2)

    return _bbox_loss_pallas(packed, bboxes2)


def pack_heads(list_heads):
    arr = np.full((4, H), -1, np.int32)
    for g, head_list in enumerate(list_heads):
        for r, idx in enumerate(head_list):
            arr[g, r] = int(idx)
    return jnp.asarray(arr)


# ---------------------- pure-python reference check ----------------------

def ref_bbox_loss(adj_np, bboxes_np, heads):
    if len(heads) == 0:
        return 0.0
    vals = []
    for h in heads:
        comp = {int(h)}
        stack = [int(h)]
        while stack:
            u = stack.pop()
            for v in range(N):
                if adj_np[u, v] != 0 and v not in comp:
                    comp.add(v)
                    stack.append(v)
        sizes = [abs(bboxes_np[i, 2] - bboxes_np[i, 0])
                 + abs(bboxes_np[i, 3] - bboxes_np[i, 1]) for i in comp]
        vals.append(sum(sizes) / len(sizes))
    return sum(vals) / len(vals)


if __name__ == "__main__":
    key = jax.random.PRNGKey(0)
    k1, k2, k3 = jax.random.split(key, 3)

    # synthetic deterministic inputs
    gp_raw = (jax.random.uniform(k1, (N, N)) < 0.15).astype(jnp.float32)   # gp_
    gpS_raw = (jax.random.uniform(k2, (N, N)) < 0.15).astype(jnp.float32)  # gp_S
    ex_bboxes = jax.random.uniform(k3, (N, 4), dtype=jnp.float32) * 100.0  # [x1,y1,x2,y2]

    question_heads = [0, 3, 7]
    answer_heads = [1, 5]
    pred_question_heads = [2, 4, 6]
    pred_answer_heads = [8]
    list_heads = (question_heads, answer_heads,
                  pred_question_heads, pred_answer_heads)
    heads_idx = pack_heads(list_heads)

    out = bbox_loss_forward(gp_raw, gpS_raw, ex_bboxes, heads_idx)
    out = jax.block_until_ready(out)

    # sanity check against a pure-python reference of the PyTorch semantics
    def sym_np(g):
        g = np.array(g)
        return ((g != 0) | (g.T != 0)).astype(np.float32)

    adj0 = sym_np(gp_raw)
    adj1 = sym_np(gpS_raw)
    bb = np.array(ex_bboxes)
    q = ref_bbox_loss(adj0, bb, question_heads)
    a = ref_bbox_loss(adj0, bb, answer_heads)
    pq = ref_bbox_loss(adj1, bb, pred_question_heads)
    pa = ref_bbox_loss(adj1, bb, pred_answer_heads)
    expected = abs(pq - q) + abs(pa - a)
    assert abs(float(out) - expected) < 1e-2, (float(out), expected)

    print("KERNEL_OK")
</pallas_src>

<mosaic_0001>
module attributes {stable_mosaic.version = 11 : i64} {
  func.func @bbox_loss_kernel(%arg0: memref<48x32xbf16, #tpu.memory_space<vmem>>, %arg1: memref<4x32xf32, #tpu.memory_space<vmem>>, %arg2: memref<1x1xf32, #tpu.memory_space<vmem>>) attributes {dimension_semantics = [], scalar_prefetch = 0 : i64, scratch_operands = 0 : i64, tpu.core_type = #tpu.core_type<tc>} {
    %c2 = arith.constant 2 : index
    %c0 = arith.constant 0 : index
    %0 = vector.load %arg1[%c2, %c0] : memref<4x32xf32, #tpu.memory_space<vmem>>, vector<1x32xf32>
    %c0_0 = arith.constant 0 : index
    %c0_1 = arith.constant 0 : index
    %1 = vector.load %arg1[%c0_0, %c0_1] : memref<4x32xf32, #tpu.memory_space<vmem>>, vector<1x32xf32>
    %2 = arith.subf %0, %1 : vector<1x32xf32>
    %3 = math.absf %2 : vector<1x32xf32>
    %c3 = arith.constant 3 : index
    %c0_2 = arith.constant 0 : index
    %4 = vector.load %arg1[%c3, %c0_2] : memref<4x32xf32, #tpu.memory_space<vmem>>, vector<1x32xf32>
    %c1 = arith.constant 1 : index
    %c0_3 = arith.constant 0 : index
    %5 = vector.load %arg1[%c1, %c0_3] : memref<4x32xf32, #tpu.memory_space<vmem>>, vector<1x32xf32>
    %6 = arith.subf %4, %5 : vector<1x32xf32>
    %7 = math.absf %6 : vector<1x32xf32>
    %8 = arith.addf %3, %7 : vector<1x32xf32>
    %c0_4 = arith.constant 0 : index
    %c0_5 = arith.constant 0 : index
    %9 = vector.load %arg0[%c0_4, %c0_5] : memref<48x32xbf16, #tpu.memory_space<vmem>>, vector<32x32xbf16>
    %c32 = arith.constant 32 : index
    %c0_6 = arith.constant 0 : index
    %10 = vector.load %arg0[%c32, %c0_6] : memref<48x32xbf16, #tpu.memory_space<vmem>>, vector<16x32xbf16>
    %cst = arith.constant dense<0.000000e+00> : vector<16x32xf32>
    %11 = tpu.matmul %10, %9, %cst {dimension_numbers = #tpu.dot_dimension_numbers<[1], [0], [0], [1], [0, 0, 1, 1], [], []>} : vector<16x32xbf16>, vector<32x32xbf16>, vector<16x32xf32> -> vector<16x32xf32>
    %12 = arith.truncf %11 : vector<16x32xf32> to vector<16x32xbf16>
    %cst_7 = arith.constant dense<0.000000e+00> : vector<32x32xf32>
    %13 = tpu.matmul %9, %9, %cst_7 {dimension_numbers = #tpu.dot_dimension_numbers<[1], [0], [0], [1], [0, 0, 1, 1], [], []>} : vector<32x32xbf16>, vector<32x32xbf16>, vector<32x32xf32> -> vector<32x32xf32>
    %14 = arith.truncf %13 : vector<32x32xf32> to vector<32x32xbf16>
    %cst_8 = arith.constant dense<0.000000e+00> : vector<16x32xf32>
    %15 = tpu.matmul %12, %14, %cst_8 {dimension_numbers = #tpu.dot_dimension_numbers<[1], [0], [0], [1], [0, 0, 1, 1], [], []>} : vector<16x32xbf16>, vector<32x32xbf16>, vector<16x32xf32> -> vector<16x32xf32>
    %16 = arith.truncf %15 : vector<16x32xf32> to vector<16x32xbf16>
    %cst_9 = arith.constant dense<0.000000e+00> : vector<32x32xf32>
    %17 = tpu.matmul %14, %14, %cst_9 {dimension_numbers = #tpu.dot_dimension_numbers<[1], [0], [0], [1], [0, 0, 1, 1], [], []>} : vector<32x32xbf16>, vector<32x32xbf16>, vector<32x32xf32> -> vector<32x32xf32>
    %18 = arith.truncf %17 : vector<32x32xf32> to vector<32x32xbf16>
    %cst_10 = arith.constant dense<0.000000e+00> : vector<16x32xf32>
    %19 = tpu.matmul %16, %18, %cst_10 {dimension_numbers = #tpu.dot_dimension_numbers<[1], [0], [0], [1], [0, 0, 1, 1], [], []>} : vector<16x32xbf16>, vector<32x32xbf16>, vector<16x32xf32> -> vector<16x32xf32>
    %20 = arith.truncf %19 : vector<16x32xf32> to vector<16x32xbf16>
    %cst_11 = arith.constant dense<0.000000e+00> : vector<32x32xf32>
    %21 = tpu.matmul %18, %18, %cst_11 {dimension_numbers = #tpu.dot_dimension_numbers<[1], [0], [0], [1], [0, 0, 1, 1], [], []>} : vector<32x32xbf16>, vector<32x32xbf16>, vector<32x32xf32> -> vector<32x32xf32>
    %22 = arith.truncf %21 : vector<32x32xf32> to vector<32x32xbf16>
    %cst_12 = arith.constant dense<0.000000e+00> : vector<16x32xf32>
    %23 = tpu.matmul %20, %22, %cst_12 {dimension_numbers = #tpu.dot_dimension_numbers<[1], [0], [0], [1], [0, 0, 1, 1], [], []>} : vector<16x32xbf16>, vector<32x32xbf16>, vector<16x32xf32> -> vector<16x32xf32>
    %cst_13 = arith.constant 0.000000e+00 : f32
    %24 = vector.broadcast %cst_13 : f32 to vector<16x32xf32>
    %25 = arith.cmpf ogt, %23, %24 : vector<16x32xf32>
    %cst_14 = arith.constant 1.000000e+00 : f32
    %cst_15 = arith.constant 0.000000e+00 : f32
    %26 = vector.broadcast %cst_14 : f32 to vector<16x32xf32>
    %27 = vector.broadcast %cst_15 : f32 to vector<16x32xf32>
    %28 = arith.select %25, %26, %27 : vector<16x32xi1>, vector<16x32xf32>
    %29 = vector.broadcast %8 : vector<1x32xf32> to vector<16x32xf32>
    %30 = arith.mulf %28, %29 : vector<16x32xf32>
    %cst_16 = arith.constant dense<0.000000e+00> : vector<16xf32>
    %31 = vector.multi_reduction <add>, %30, %cst_16 [1] : vector<16x32xf32> to vector<16xf32>
    %32 = vector.shape_cast %31 : vector<16xf32> to vector<16x1xf32>
    %cst_17 = arith.constant dense<0.000000e+00> : vector<16xf32>
    %33 = vector.multi_reduction <add>, %28, %cst_17 [1] : vector<16x32xf32> to vector<16xf32>
    %34 = vector.shape_cast %33 : vector<16xf32> to vector<16x1xf32>
    %cst_18 = arith.constant 0.000000e+00 : f32
    %35 = vector.broadcast %cst_18 : f32 to vector<16x1xf32>
    %36 = arith.cmpf ogt, %34, %35 : vector<16x1xf32>
    %37 = arith.extui %36 : vector<16x1xi1> to vector<16x1xi32>
    %38 = arith.sitofp %37 : vector<16x1xi32> to vector<16x1xf32>
    %cst_19 = arith.constant 0.000000e+00 : f32
    %39 = vector.broadcast %cst_19 : f32 to vector<16x1xf32>
    %40 = arith.cmpf ogt, %34, %39 : vector<16x1xf32>
    %cst_20 = arith.constant 1.000000e+00 : f32
    %41 = vector.broadcast %cst_20 : f32 to vector<16x1xf32>
    %42 = arith.maximumf %34, %41 : vector<16x1xf32>
    %43 = arith.divf %32, %42 : vector<16x1xf32>
    %cst_21 = arith.constant 0.000000e+00 : f32
    %44 = vector.broadcast %cst_21 : f32 to vector<16x1xf32>
    %45 = arith.select %40, %43, %44 : vector<16x1xi1>, vector<16x1xf32>
    %46 = vector.extract_strided_slice %45 {offsets = [0, 0], sizes = [4, 1], strides = [1, 1]} : vector<16x1xf32> to vector<4x1xf32>
    %cst_22 = arith.constant dense<0.000000e+00> : vector<1xf32>
    %47 = vector.multi_reduction <add>, %46, %cst_22 [0] : vector<4x1xf32> to vector<1xf32>
    %48 = vector.shape_cast %47 : vector<1xf32> to vector<1x1xf32>
    %49 = vector.extract_strided_slice %38 {offsets = [0, 0], sizes = [4, 1], strides = [1, 1]} : vector<16x1xf32> to vector<4x1xf32>
    %cst_23 = arith.constant dense<0.000000e+00> : vector<1xf32>
    %50 = vector.multi_reduction <add>, %49, %cst_23 [0] : vector<4x1xf32> to vector<1xf32>
    %51 = vector.shape_cast %50 : vector<1xf32> to vector<1x1xf32>
    %cst_24 = arith.constant 0.000000e+00 : f32
    %52 = vector.broadcast %cst_24 : f32 to vector<1x1xf32>
    %53 = arith.cmpf ogt, %51, %52 : vector<1x1xf32>
    %cst_25 = arith.constant 1.000000e+00 : f32
    %54 = vector.broadcast %cst_25 : f32 to vector<1x1xf32>
    %55 = arith.maximumf %51, %54 : vector<1x1xf32>
    %56 = arith.divf %48, %55 : vector<1x1xf32>
    %cst_26 = arith.constant 0.000000e+00 : f32
    %57 = vector.broadcast %cst_26 : f32 to vector<1x1xf32>
    %58 = arith.select %53, %56, %57 : vector<1x1xi1>, vector<1x1xf32>
    %59 = vector.extract_strided_slice %45 {offsets = [4, 0], sizes = [4, 1], strides = [1, 1]} : vector<16x1xf32> to vector<4x1xf32>
    %cst_27 = arith.constant dense<0.000000e+00> : vector<1xf32>
    %60 = vector.multi_reduction <add>, %59, %cst_27 [0] : vector<4x1xf32> to vector<1xf32>
    %61 = vector.shape_cast %60 : vector<1xf32> to vector<1x1xf32>
    %62 = vector.extract_strided_slice %38 {offsets = [4, 0], sizes = [4, 1], strides = [1, 1]} : vector<16x1xf32> to vector<4x1xf32>
    %cst_28 = arith.constant dense<0.000000e+00> : vector<1xf32>
    %63 = vector.multi_reduction <add>, %62, %cst_28 [0] : vector<4x1xf32> to vector<1xf32>
    %64 = vector.shape_cast %63 : vector<1xf32> to vector<1x1xf32>
    %cst_29 = arith.constant 0.000000e+00 : f32
    %65 = vector.broadcast %cst_29 : f32 to vector<1x1xf32>
    %66 = arith.cmpf ogt, %64, %65 : vector<1x1xf32>
    %cst_30 = arith.constant 1.000000e+00 : f32
    %67 = vector.broadcast %cst_30 : f32 to vector<1x1xf32>
    %68 = arith.maximumf %64, %67 : vector<1x1xf32>
    %69 = arith.divf %61, %68 : vector<1x1xf32>
    %cst_31 = arith.constant 0.000000e+00 : f32
    %70 = vector.broadcast %cst_31 : f32 to vector<1x1xf32>
    %71 = arith.select %66, %69, %70 : vector<1x1xi1>, vector<1x1xf32>
    %72 = vector.extract_strided_slice %45 {offsets = [8, 0], sizes = [4, 1], strides = [1, 1]} : vector<16x1xf32> to vector<4x1xf32>
    %cst_32 = arith.constant dense<0.000000e+00> : vector<1xf32>
    %73 = vector.multi_reduction <add>, %72, %cst_32 [0] : vector<4x1xf32> to vector<1xf32>
    %74 = vector.shape_cast %73 : vector<1xf32> to vector<1x1xf32>
    %75 = vector.extract_strided_slice %38 {offsets = [8, 0], sizes = [4, 1], strides = [1, 1]} : vector<16x1xf32> to vector<4x1xf32>
    %cst_33 = arith.constant dense<0.000000e+00> : vector<1xf32>
    %76 = vector.multi_reduction <add>, %75, %cst_33 [0] : vector<4x1xf32> to vector<1xf32>
    %77 = vector.shape_cast %76 : vector<1xf32> to vector<1x1xf32>
    %cst_34 = arith.constant 0.000000e+00 : f32
    %78 = vector.broadcast %cst_34 : f32 to vector<1x1xf32>
    %79 = arith.cmpf ogt, %77, %78 : vector<1x1xf32>
    %cst_35 = arith.constant 1.000000e+00 : f32
    %80 = vector.broadcast %cst_35 : f32 to vector<1x1xf32>
    %81 = arith.maximumf %77, %80 : vector<1x1xf32>
    %82 = arith.divf %74, %81 : vector<1x1xf32>
    %cst_36 = arith.constant 0.000000e+00 : f32
    %83 = vector.broadcast %cst_36 : f32 to vector<1x1xf32>
    %84 = arith.select %79, %82, %83 : vector<1x1xi1>, vector<1x1xf32>
    %85 = vector.extract_strided_slice %45 {offsets = [12, 0], sizes = [4, 1], strides = [1, 1]} : vector<16x1xf32> to vector<4x1xf32>
    %cst_37 = arith.constant dense<0.000000e+00> : vector<1xf32>
    %86 = vector.multi_reduction <add>, %85, %cst_37 [0] : vector<4x1xf32> to vector<1xf32>
    %87 = vector.shape_cast %86 : vector<1xf32> to vector<1x1xf32>
    %88 = vector.extract_strided_slice %38 {offsets = [12, 0], sizes = [4, 1], strides = [1, 1]} : vector<16x1xf32> to vector<4x1xf32>
    %cst_38 = arith.constant dense<0.000000e+00> : vector<1xf32>
    %89 = vector.multi_reduction <add>, %88, %cst_38 [0] : vector<4x1xf32> to vector<1xf32>
    %90 = vector.shape_cast %89 : vector<1xf32> to vector<1x1xf32>
    %cst_39 = arith.constant 0.000000e+00 : f32
    %91 = vector.broadcast %cst_39 : f32 to vector<1x1xf32>
    %92 = arith.cmpf ogt, %90, %91 : vector<1x1xf32>
    %cst_40 = arith.constant 1.000000e+00 : f32
    %93 = vector.broadcast %cst_40 : f32 to vector<1x1xf32>
    %94 = arith.maximumf %90, %93 : vector<1x1xf32>
    %95 = arith.divf %87, %94 : vector<1x1xf32>
    %cst_41 = arith.constant 0.000000e+00 : f32
    %96 = vector.broadcast %cst_41 : f32 to vector<1x1xf32>
    %97 = arith.select %92, %95, %96 : vector<1x1xi1>, vector<1x1xf32>
    %98 = arith.subf %84, %58 : vector<1x1xf32>
    %99 = math.absf %98 : vector<1x1xf32>
    %100 = arith.subf %97, %71 : vector<1x1xf32>
    %101 = math.absf %100 : vector<1x1xf32>
    %102 = arith.addf %99, %101 : vector<1x1xf32>
    %c0_42 = arith.constant 0 : index
    %c0_43 = arith.constant 0 : index
    %103 = vector.load %arg2[%c0_42, %c0_43] : memref<1x1xf32, #tpu.memory_space<vmem>>, vector<1x1xf32>
    tpu.vector_store %arg2[%c0_42, %c0_43], %102 {strides = array<i32>} : memref<1x1xf32, #tpu.memory_space<vmem>>, vector<1x1xf32>,
    return
  }
}

</mosaic_0001>

<bundles_post_ra>
// kernel: eq.10
= control target key start
LH: loop header
LB: loop body
LE: loop exit
PB: predicated region body
PF: predicated region fallthrough
CT: control target
= control target key end

     0   :  { %vm8_vm0 = vcmask 31744   ;;  %s40_s8 = smov 4   ;;  %s41_s9 = smov 8   ;;  %vm14_vm1 = vcmask 130144   ;;  %vm20_vm2 = vcmask 97344   ;;  %vm26_vm3 = vcmask 64544   ;;  %s58_s0 = inlined_call_operand.vmem [shape: s32[4,4], index: 0, kind: input, shape index: {}]   ;;  %s59_s1 = inlined_call_operand.vmem [shape: s32[16], index: 1, kind: output, shape index: {}]  }
   0x1   :  { %v5_v0 = vld [vmem:[%s58_s0] sm:$0xf]  ;;  %s39_s0 = smov 12  }
   0x2   :  { %6 = vst [vmem:[#allocation1] sm:$0xf] %v5_v0 }
   0x9   :  { %v11_v1 = vld [vmem:[#allocation1 + $0x3] sm:$0x1]   ;;  %v23_v2 = vld [vmem:[#allocation1 + $0x1] sm:$0x1]   ;;  %v7_v3 = vld [vmem:[#allocation1] sm:$0x1]  }
   0xa   :  { %12 = vrot.lane.b32.xlu0 %v11_v1, %s39_s0  ;;  %24 = vrot.lane.b32.xlu1 %v23_v2, %s40_s8  ;;  %v17_v4 = vld [vmem:[#allocation1 + $0x2] sm:$0x1]   ;;  %9 = vst.msk [vmem:[#allocation0] sm:$0x1] %vm8_vm0, %v7_v3  }
   0xe   :  { %18 = vrot.lane.b32.xlu0 %v17_v4, %s41_s9 }
  0x7c   :  { %v13_v5 = vpop.permute.xlu0 %12   ;;  %v25_v6 = vpop.permute.xlu1 %24  }
  0x7d   :  { %15 = vst.msk [vmem:[#allocation0] sm:$0x1] %vm14_vm1, %v13_v5  }
  0x80   :  { %v19_v7 = vpop.permute.xlu0 %18  }
  0x81   :  { %21 = vst.msk [vmem:[#allocation0] sm:$0x1] %vm20_vm2, %v19_v7  }
  0x82   :  { %27 = vst.msk [vmem:[#allocation0] sm:$0x1] %vm26_vm3, %v25_v6  }
  0x89   :  { %v32_v8 = vld [vmem:[#allocation0] sm:$0x1] }
  0x8a   :  { %35 = vst [vmem:[%s59_s1] sm:$0x1] %v32_v8 }

// kernel: bbox_loss_forward.1
= control target key start
LH: loop header
LB: loop body
LE: loop exit
PB: predicated region body
PF: predicated region fallthrough
CT: control target
= control target key end

     0   :  { %vm45_vm0 = vcmask 261120   ;;  %v677_v2 = vmov 0.0   ;;  %s769_s0 = inlined_call_operand.vmem [shape: bf16[48,32], index: 0, kind: input, shape index: {}]   ;;  %s770_s1 = inlined_call_operand.vmem [shape: f32[4,32], index: 1, kind: input, shape index: {}]   ;;  %s771_s2 = inlined_call_operand.hbm [shape: f32[1,1], index: 2, kind: output, shape index: {}]  }
   0x1   :  { %v640_v0 = vld [vmem:[%s769_s0 + $0x8] sm:$0xff]   ;;  %v641_v1 = vld [vmem:[%s769_s0] sm:$0xff]   ;;  %581 = vmatprep.subr.bf16.mxu0 %v677_v2 }
   0x2   :  { %589 = vmatprep.subr.bf16.mxu1 %v640_v0  ;;  %593 = vmatprep.mubr.msk.bf16.mxu1 %vm45_vm0, %v641_v1 }
   0x3   :  { %590 = vmatpush3.bf16.msra.mxu1 %v640_v0 }
   0x4   :  { %7 = vsyncpa [#allocation3], 0  ;;  %591 = vmatprep.subr.bf16.mxu1 %v641_v1  ;;  %582 = vmatpush3.bf16.msra.mxu0 %v640_v0  ;;  %vm678_vm1 = vmmov 0   ;;  %v642_v3 = vld [vmem:[%s769_s0 + $0x10] sm:$0xff]   ;;  %v13_v37 = vld [vmem:[%s770_s1 + $0x2] sm:$0x1]  ;;  %v400_v43 = vlaneseq }
   0x5   :  { %583 = vmatprep.subr.bf16.mxu0 %v677_v2  ;;  %585 = vmatprep.mubr.msk.bf16.mxu0 %vm678_vm1, %v677_v2  ;;  %v14_v38 = vld [vmem:[%s770_s1] sm:$0x1]  ;;  %v17_v39 = vld [vmem:[%s770_s1 + $0x3] sm:$0x1]  ;;  %v18_v40 = vld [vmem:[%s770_s1 + $0x1] sm:$0x1] }
   0x6   :  { %v15_v41 = vsub.f32 %v13_v37, %v14_v38  ;;  %v19_v42 = vsub.f32 %v17_v39, %v18_v40  ;;  %v401_v46 = vshrl.u32 %v400_v43, 7  ;;  %vm432_vm4 = vcmask 1043456   ;;  %s679_s1 = smov [#allocation2]  }
   0x7   :  { %592 = vmatpush3.bf16.msra.mxu1 %v641_v1  ;;  %s534_s22 = sshll.u32 %s679_s1, 4  ;;  %vm526_vm11 = vcmask 0   ;;  %s535_s22 = int_to_ptr.vmem [resolvable:$true] %s534_s22 }
   0x8   :  { %584 = vmatpush3.bf16.msra.mxu0 %v641_v1  ;;  %v16_v44 = vand.u32 2147483647, %v15_v41  ;;  %v20_v45 = vand.u32 2147483647, %v19_v42  ;;  %v402_v48 = vsub.s32 0, %v401_v46  ;;  %s655_s23 = scalar_lea.vmem %s535_s22, 16  ;;  %p660_p1 = scmp.lt.s32.totalorder %s535_s22, %s535_s22 }
   0x9   :  { %597 = vmatprep.subr.bf16.mxu0 %v677_v2  ;;  %p656_p0 = scmp.ne.s32.totalorder %s535_s22, %s655_s23  ;;  %s659_s24 = scalar_lea.vmem %s535_s22, 32 }
   0xa   :  { %594 = vmatmul.mubr.msk.bf16.vlgmr.msra.gmra.mxu1 %vm45_vm0, %v640_v0  ;;  %v21_v47 = vadd.f32 %v20_v45, %v16_v44  ;;  %p661_p2 = scmp.lt.s32.totalorder %s659_s24, %s655_s23 }
   0xb   :  { %586 = vmatmul.mubr.msk.bf16.vlgmr.msra.gmra.mxu0 %vm45_vm0, %v642_v3 }
   0xc   :  { %601 = vmatprep.mubr.msk.bf16.mxu0 %vm678_vm1, %v677_v2  ;;  %v403_v49 = vrot.slane %v21_v47, %v402_v48  ;;  %p662_p3 = por %p661_p2, %p660_p1 }
   0xe   :  { %p663_p4 = pnand %p662_p3, %p656_p0 }
  0xca   :  { %v595_v4 = vpop.f32.mrf.mxu1 }
  0xcb   :  { %v83_v5 = vpop.f32.mrf.mxu0 }
  0xcc   :  { %v131_v6 = vpop.f32.mrf.mxu1 }
  0xcd   :  { %v587_v7 = vpop.f32.mrf.mxu0 }
  0xce   :  { %v596_v8 = vpop.f32.mrf.mxu1 }
  0xcf   :  { %v147_v9 = vpack.c.bf16 %v596_v8, %v595_v4  ;;  %v86_v10 = vpop.f32.mrf.mxu0 }
  0xd0   :  { %v134_v11 = vpop.f32.mrf.mxu1  ;;  %v90_v14 = vpack.c.bf16 %v86_v10, %v83_v5 }
  0xd1   :  { %v146_v12 = vpack.c.bf16 %v134_v11, %v131_v6  ;;  %598 = vmatpush3.bf16.msra.mxu0 %v147_v9  ;;  %605 = vmatprep.subr.bf16.mxu1 %v147_v9  ;;  %v588_v13 = vpop.f32.mrf.mxu0 }
  0xd2   :  { %606 = vmatpush3.bf16.msra.mxu1 %v147_v9  ;;  %599 = vmatprep.subr.bf16.mxu0 %v677_v2 }
  0xd3   :  { %607 = vmatprep.subr.bf16.mxu1 %v146_v12  ;;  %609 = vmatprep.mubr.msk.bf16.mxu1 %vm45_vm0, %v146_v12 }
  0xd5   :  { %600 = vmatpush3.bf16.msra.mxu0 %v146_v12 }
  0xd6   :  { %608 = vmatpush3.bf16.msra.mxu1 %v146_v12  ;;  %613 = vmatprep.subr.bf16.mxu0 %v677_v2 }
  0xd8   :  { %602 = vmatmul.mubr.msk.bf16.vlgmr.msra.gmra.mxu0 %vm45_vm0, %v90_v14 }
  0xd9   :  { %610 = vmatmul.mubr.msk.bf16.vlgmr.msra.gmra.mxu1 %vm45_vm0, %v147_v9  ;;  %617 = vmatprep.mubr.msk.bf16.mxu0 %vm678_vm1, %v677_v2 }
 0x198   :  { %v185_v15 = vpop.f32.mrf.mxu0 }
 0x199   :  { %v611_v16 = vpop.f32.mrf.mxu1 }
 0x19a   :  { %v603_v17 = vpop.f32.mrf.mxu0 }
 0x19b   :  { %v233_v18 = vpop.f32.mrf.mxu1 }
 0x19c   :  { %v188_v19 = vpop.f32.mrf.mxu0 }
 0x19d   :  { %v612_v20 = vpop.f32.mrf.mxu1  ;;  %v192_v25 = vpack.c.bf16 %v188_v19, %v185_v15 }
 0x19e   :  { %v249_v21 = vpack.c.bf16 %v612_v20, %v611_v16  ;;  %v604_v22 = vpop.f32.mrf.mxu0 }
 0x19f   :  { %v236_v23 = vpop.f32.mrf.mxu1 }
 0x1a0   :  { %v248_v24 = vpack.c.bf16 %v236_v23, %v233_v18  ;;  %614 = vmatpush3.bf16.msra.mxu0 %v249_v21  ;;  %621 = vmatprep.subr.bf16.mxu1 %v249_v21 }
 0x1a1   :  { %622 = vmatpush3.bf16.msra.mxu1 %v249_v21  ;;  %615 = vmatprep.subr.bf16.mxu0 %v677_v2 }
 0x1a2   :  { %623 = vmatprep.subr.bf16.mxu1 %v248_v24  ;;  %625 = vmatprep.mubr.msk.bf16.mxu1 %vm45_vm0, %v248_v24 }
 0x1a4   :  { %616 = vmatpush3.bf16.msra.mxu0 %v248_v24 }
 0x1a5   :  { %624 = vmatpush3.bf16.msra.mxu1 %v248_v24  ;;  %629 = vmatprep.subr.bf16.mxu0 %v677_v2 }
 0x1a7   :  { %618 = vmatmul.mubr.msk.bf16.vlgmr.msra.gmra.mxu0 %vm45_vm0, %v192_v25 }
 0x1a8   :  { %626 = vmatmul.mubr.msk.bf16.vlgmr.msra.gmra.mxu1 %vm45_vm0, %v249_v21  ;;  %633 = vmatprep.mubr.msk.bf16.mxu0 %vm678_vm1, %v677_v2 }
 0x267   :  { %v287_v26 = vpop.f32.mrf.mxu0 }
 0x268   :  { %v627_v27 = vpop.f32.mrf.mxu1 }
 0x269   :  { %v619_v28 = vpop.f32.mrf.mxu0 }
 0x26a   :  { %v335_v29 = vpop.f32.mrf.mxu1 }
 0x26b   :  { %v290_v30 = vpop.f32.mrf.mxu0 }
 0x26c   :  { %v628_v31 = vpop.f32.mrf.mxu1  ;;  %v294_v36 = vpack.c.bf16 %v290_v30, %v287_v26 }
 0x26d   :  { %v351_v32 = vpack.c.bf16 %v628_v31, %v627_v27  ;;  %v620_v33 = vpop.f32.mrf.mxu0 }
 0x26e   :  { %v338_v34 = vpop.f32.mrf.mxu1 }
 0x26f   :  { %630 = vmatpush3.bf16.msra.mxu0 %v351_v32  ;;  %v350_v35 = vpack.c.bf16 %v338_v34, %v335_v29 }
 0x270   :  { %631 = vmatprep.subr.bf16.mxu0 %v677_v2 }
 0x273   :  { %632 = vmatpush3.bf16.msra.mxu0 %v350_v35 }
 0x276   :  { %634 = vmatmul.mubr.msk.bf16.vlgmr.msra.gmra.mxu0 %vm45_vm0, %v294_v36 }
 0x336   :  { %v389_v50 = vpop.f32.mrf.mxu0 }
 0x337   :  { %vm396_vm2 = vcmp.gt.f32.partialorder %v389_v50, 0.0 }
 0x338   :  { %v635_v51 = vpop.f32.mrf.mxu0  ;;  %v398_v52 = vsel %vm396_vm2, 1.0, %v677_v2 }
 0x339   :  { %v412_v53 = vsel %vm45_vm0, %v398_v52, 0.0  ;;  %v404_v54 = vmul.f32 %v403_v49, %v398_v52 }
 0x33a   :  { %413 = vadd.xlane.f32.xlu0 %v412_v53  ;;  %v392_v55 = vpop.f32.mrf.mxu0 }
 0x33b   :  { %vm397_vm3 = vcmp.gt.f32.partialorder %v392_v55, 0.0  ;;  %v406_v56 = vsel %vm45_vm0, %v404_v54, 0.0 }
 0x33c   :  { %v636_v57 = vpop.f32.mrf.mxu0  ;;  %407 = vadd.xlane.f32.xlu1 %v406_v56  ;;  %v399_v58 = vsel %vm397_vm3, 1.0, %v677_v2 }
 0x33d   :  { %v415_v59 = vsel %vm45_vm0, %v399_v58, 0.0  ;;  %v405_v60 = vmul.f32 %v403_v49, %v399_v58 }
 0x33e   :  { %416 = vadd.xlane.f32.xlu0 %v415_v59 }
 0x33f   :  { %v409_v61 = vsel %vm45_vm0, %v405_v60, 0.0 }
 0x340   :  { %410 = vadd.xlane.f32.xlu1 %v409_v61 }
 0x3c3   :  { %v414_v62 = vpop.xlane.xlu0 %413 }
 0x3c4   :  { %vm418_vm5 = vcmp.gt.f32.partialorder %v414_v62, 0.0  ;;  %v424_v63 = vmax.f32 %v414_v62, 1.0 }
 0x3c5   :  { %v555_v0 = vsel %vm418_vm5, 1.0, %v677_v2  ;;  %v408_v26 = vpop.xlane.xlu1 %407 }
 0x3c6   :  { %643 = vrcp.f32 %v424_v63  ;;  %v440_v1 = vsel %vm432_vm4, %v555_v0, 0.0  ;;  %v463_v3 = vrot.slane %v555_v0, 4 }
 0x3c7   :  { %v441_v4 = vrot.slane %v440_v1, 4  ;;  %v417_v5 = vpop.xlane.xlu0 %416 }
 0x3c8   :  { %v465_v6 = vsel %vm432_vm4, %v463_v3, 0.0  ;;  %vm419_vm6 = vcmp.gt.f32.partialorder %v417_v5, 0.0  ;;  %v425_v7 = vmax.f32 %v417_v5, 1.0 }
 0x3c9   :  { %v442_v8 = vadd.f32 %v441_v4, %v440_v1  ;;  %v466_v9 = vrot.slane %v465_v6, 4  ;;  %v556_v10 = vsel %vm419_vm6, 1.0, %v677_v2  ;;  %v411_v44 = vpop.xlane.xlu1 %410 }
 0x3ca   :  { %645 = vrcp.f32 %v425_v7  ;;  %v484_v11 = vsel %vm432_vm4, %v556_v10, 0.0  ;;  %v507_v12 = vrot.slane %v556_v10, 4 }
 0x3cb   :  { %v443_v13 = vrot.slane %v442_v8, 2  ;;  %v467_v14 = vadd.f32 %v466_v9, %v465_v6  ;;  %v485_v15 = vrot.slane %v484_v11, 4 }
 0x3cc   :  { %v509_v16 = vsel %vm432_vm4, %v507_v12, 0.0 }
 0x3cd   :  { %v444_v17 = vadd.f32 %v443_v13, %v442_v8  ;;  %v468_v18 = vrot.slane %v467_v14, 2  ;;  %v486_v19 = vadd.f32 %v485_v15, %v484_v11  ;;  %v510_v20 = vrot.slane %v509_v16, 4 }
 0x3cf   :  { %v445_v21 = vrot.slane %v444_v17, 1  ;;  %v469_v22 = vadd.f32 %v468_v18, %v467_v14  ;;  %v487_v23 = vrot.slane %v486_v19, 2  ;;  %v511_v24 = vadd.f32 %v510_v20, %v509_v16 }
 0x3d1   :  { %v756_v25 = vadd.f32 %v445_v21, %v444_v17  ;;  %v470_v2 = vrot.slane %v469_v22, 1  ;;  %v488_v27 = vadd.f32 %v487_v23, %v486_v19  ;;  %v512_v28 = vrot.slane %v511_v24, 2 }
 0x3d3   :  { %v644_v29 = vpop.eup %643  ;;  %v448_v30 = vmax.f32 %v756_v25, 1.0  ;;  %v489_v31 = vrot.slane %v488_v27, 1  ;;  %v513_v32 = vadd.f32 %v512_v28, %v511_v24  ;;  %v471_v34 = vadd.f32 %v470_v2, %v469_v22 }
 0x3d4   :  { %v427_v33 = vmul.f32 %v644_v29, %v408_v26  ;;  %vm447_vm7 = vcmp.gt.f32.partialorder %v756_v25, 0.0 }
 0x3d5   :  { %v490_v35 = vadd.f32 %v489_v31, %v488_v27  ;;  %v514_v36 = vrot.slane %v513_v32, 1  ;;  %647 = vrcp.f32 %v448_v30  ;;  %v473_v38 = vmax.f32 %v471_v34, 1.0 }
 0x3d6   :  { %v430_v37 = vsel %vm418_vm5, %v427_v33, 0.0  ;;  %vm472_vm9 = vcmp.gt.f32.partialorder %v471_v34, 0.0 }
 0x3d7   :  { %v646_v39 = vpop.eup %645  ;;  %v433_v40 = vsel %vm432_vm4, %v430_v37, 0.0  ;;  %v453_v41 = vrot.slane %v430_v37, 4  ;;  %v492_v42 = vmax.f32 %v490_v35, 1.0  ;;  %v515_v43 = vadd.f32 %v514_v36, %v513_v32 }
 0x3d8   :  { %v434_v45 = vrot.slane %v433_v40, 4  ;;  %v429_v46 = vmul.f32 %v646_v39, %v411_v44  ;;  %649 = vrcp.f32 %v473_v38  ;;  %vm491_vm8 = vcmp.gt.f32.partialorder %v490_v35, 0.0 }
 0x3d9   :  { %v455_v47 = vsel %vm432_vm4, %v453_v41, 0.0  ;;  %651 = vrcp.f32 %v492_v42  ;;  %v517_v48 = vmax.f32 %v515_v43, 1.0  ;;  %vm516_vm10 = vcmp.gt.f32.partialorder %v515_v43, 0.0 }
 0x3da   :  { %v435_v49 = vadd.f32 %v434_v45, %v433_v40  ;;  %v456_v50 = vrot.slane %v455_v47, 4  ;;  %v431_v51 = vsel %vm419_vm6, %v429_v46, 0.0 }
 0x3db   :  { %653 = vrcp.f32 %v517_v48  ;;  %v477_v52 = vsel %vm432_vm4, %v431_v51, 0.0  ;;  %v497_v53 = vrot.slane %v431_v51, 4 }
 0x3dc   :  { %v436_v54 = vrot.slane %v435_v49, 2  ;;  %v457_v55 = vadd.f32 %v456_v50, %v455_v47  ;;  %v478_v56 = vrot.slane %v477_v52, 4 }
 0x3dd   :  { %v499_v57 = vsel %vm432_vm4, %v497_v53, 0.0 }
 0x3de   :  { %v437_v58 = vadd.f32 %v436_v54, %v435_v49  ;;  %v458_v59 = vrot.slane %v457_v55, 2  ;;  %v479_v60 = vadd.f32 %v478_v56, %v477_v52  ;;  %v500_v61 = vrot.slane %v499_v57, 4 }
 0x3e0   :  { %v438_v62 = vrot.slane %v437_v58, 1  ;;  %v459_v63 = vadd.f32 %v458_v59, %v457_v55  ;;  %v480_v0 = vrot.slane %v479_v60, 2  ;;  %v501_v1 = vadd.f32 %v500_v61, %v499_v57 }
 0x3e2   :  { %v439_v3 = vadd.f32 %v438_v62, %v437_v58  ;;  %v460_v4 = vrot.slane %v459_v63, 1  ;;  %v481_v5 = vadd.f32 %v480_v0, %v479_v60  ;;  %v502_v6 = vrot.slane %v501_v1, 2  ;;  %v648_v7 = vpop.eup %647 }
 0x3e4   :  { %v461_v8 = vadd.f32 %v460_v4, %v459_v63  ;;  %v482_v9 = vrot.slane %v481_v5, 1  ;;  %v503_v10 = vadd.f32 %v502_v6, %v501_v1  ;;  %v450_v15 = vmul.f32 %v648_v7, %v439_v3 }
 0x3e5   :  { %v650_v11 = vpop.eup %649 }
 0x3e6   :  { %v652_v12 = vpop.eup %651  ;;  %v483_v13 = vadd.f32 %v482_v9, %v481_v5  ;;  %v504_v14 = vrot.slane %v503_v10, 1  ;;  %v475_v18 = vmul.f32 %v650_v11, %v461_v8  ;;  %v451_v20 = vsel %vm447_vm7, %v450_v15, 0.0 }
 0x3e8   :  { %v654_v16 = vpop.eup %653  ;;  %v505_v17 = vadd.f32 %v504_v14, %v503_v10  ;;  %v494_v19 = vmul.f32 %v652_v12, %v483_v13  ;;  %v476_v24 = vsel %vm472_vm9, %v475_v18, 0.0 }
 0x3ea   :  { %v495_v21 = vsel %vm491_vm8, %v494_v19, 0.0  ;;  %v519_v22 = vmul.f32 %v654_v16, %v505_v17 }
 0x3eb   :  { %v521_v23 = vsub.f32 %v495_v21, %v451_v20 }
 0x3ec   :  { %v520_v2 = vsel %vm516_vm10, %v519_v22, 0.0 }
 0x3ed   :  { %v523_v26 = vsub.f32 %v520_v2, %v476_v24  ;;  %v522_v27 = vand.u32 2147483647, %v521_v23 }
 0x3ef   :  { %v524_v28 = vand.u32 2147483647, %v523_v26 }
 0x3f1   :  { %v525_v29 = vadd.f32 %v524_v28, %v522_v27 }
 0x3f3   :  { %527 = vst.msk [vmem:[#allocation2] sm:$0x1] %vm526_vm11, %v525_v29 }
 0x3f4   :  { %666 = shalt.err (!%p663_p4)
}
 0x3f5   :  { %537 = dma.vmem_to_hbm [thread:$0]  %s535_s22, 16, %s771_s2, [#allocation3]  }
 0x3f6   :  { %675 = dma.done.wait [#allocation3], 16  }
 0x3f7   :  { %676 = vsyncadd [#allocation3], 4294967280 }
 0x3f8   :  { %541 = vsyncpa [#allocation3], 1 }

</bundles_post_ra>
